<compile_context>
chip_gen: v7x
topology: tpu7x:2x2x1
jax: 0.10.0
libtpu: 0.0.40
codegen_flags: <defaults>
</compile_context>

<pallas_src>
import math
import functools

import jax
import jax.numpy as jnp
from jax.experimental import pallas as pl
from jax.experimental.pallas import tpu as pltpu


# --------------------------------------------------------------------------------------
# In-kernel exact-GELU.  PyTorch's default F.gelu uses erf; lax.erf is not guaranteed to
# lower in Mosaic, so we use the Abramowitz–Stegun 7.1.26 rational approximation
# (|error| < 1.5e-7), built only from ops that always lower (mul/add/div/exp/where).
# --------------------------------------------------------------------------------------
def _erf(x):
    a1, a2, a3, a4, a5 = 0.254829592, -0.284496736, 1.421413741, -1.453152027, 1.061405429
    p = 0.3275911
    ax = jnp.abs(x)
    t = 1.0 / (1.0 + p * ax)
    poly = ((((a5 * t + a4) * t + a3) * t + a2) * t + a1) * t
    y = 1.0 - poly * jnp.exp(-ax * ax)
    return jnp.where(x < 0.0, -y, y)


def _gelu_exact(x):
    return 0.5 * x * (1.0 + _erf(x * 0.7071067811865476))


# --------------------------------------------------------------------------------------
# Kernel: one row-tile of the flattened input, full MLP applied in VMEM.
#   refs = (x_ref, w0, b0, w1, b1, ..., [wsc, bsc], [gamma, beta], o_ref)
# --------------------------------------------------------------------------------------
def _mlp_kernel(*refs, n_layers: int, has_shortcut: bool, has_norm: bool, eps: float):
    x_ref, o_ref = refs[0], refs[-1]
    p = refs[1:-1]

    x = x_ref[...].astype(jnp.float32)          # (TM, in_dim)
    xb = x.astype(jnp.bfloat16)                 # bf16 operand reused by layer 0 + shortcut

    h = x
    idx = 0
    for i in range(n_layers):
        w = p[idx][...]                         # (K, N) bf16 weight tile (already bf16 in HBM)
        b = p[idx + 1][0]                       # (N,)   f32 bias
        idx += 2
        hb = xb if i == 0 else h.astype(jnp.bfloat16)
        h = jnp.dot(hb, w, preferred_element_type=jnp.float32) + b
        if i < n_layers - 1:
            h = _gelu_exact(h)                  # f32 elementwise (VPU/EUP)

    if has_shortcut:
        wsc = p[idx][...]
        bsc = p[idx + 1][0]
        idx += 2
        h = h + jnp.dot(xb, wsc, preferred_element_type=jnp.float32) + bsc

    if has_norm:
        g = p[idx][0]
        be = p[idx + 1][0]
        idx += 2
        mu = jnp.mean(h, axis=-1, keepdims=True)
        var = jnp.mean((h - mu) * (h - mu), axis=-1, keepdims=True)
        h = (h - mu) * jax.lax.rsqrt(var + eps) * g + be

    o_ref[...] = h.astype(o_ref.dtype)


def _round_up(a: int, b: int) -> int:
    return (a + b - 1) // b * b


# --------------------------------------------------------------------------------------
# Wrapper
# --------------------------------------------------------------------------------------
def mlp_forward(x, params, *, eps: float = 1e-5):
    """x: (..., in_dim) float32.  params: dict from init_params()."""
    layers = params["layers"]
    shortcut = params["shortcut"]
    norm = params["norm"]

    n_layers = len(layers)
    in_dim = x.shape[-1]
    out_dim = layers[-1][0].shape[1]
    orig_lead = x.shape[:-1]
    M = int(math.prod(orig_lead)) if orig_lead else 1

    # Flatten leading dims (free, row-major) and pad rows to a sublane-aligned tile.
    xf = x.reshape(M, in_dim)
    TM = min(512, _round_up(M, 8))
    Mp = _round_up(M, TM)
    if Mp != M:
        xf = jnp.pad(xf, ((0, Mp - M), (0, 0)))

    # Flat parameter list in the order the kernel consumes them.
    flat_params = []
    for (w, b) in layers:
        flat_params += [w, b]
    if shortcut is not None:
        flat_params += list(shortcut)
    if norm is not None:
        flat_params += list(norm)

    # BlockSpecs: x/out are row tiles; every weight/bias is a full block with a constant
    # index_map (fetched once, reused across all grid steps).
    in_specs = [pl.BlockSpec((TM, in_dim), lambda m: (m, 0))]
    for arr in flat_params:
        in_specs.append(pl.BlockSpec(arr.shape, lambda m: (0, 0)))
    out_spec = pl.BlockSpec((TM, out_dim), lambda m: (m, 0))

    # Size the scoped VMEM to the working set (+ headroom), clamped to physical limits.
    weight_bytes = sum(int(a.size) * a.dtype.itemsize for a in flat_params)
    widths = [in_dim, out_dim] + [w.shape[1] for (w, _) in layers]
    max_w = max(widths)
    act_bytes = 2 * TM * (in_dim + out_dim) * 4       # double-buffered x / out tiles
    scratch_bytes = 8 * TM * max_w * 4                # in-kernel intermediates headroom
    vmem_limit = 2 * weight_bytes + act_bytes + scratch_bytes + (4 << 20)
    vmem_limit = int(min(max(vmem_limit, 16 << 20), 64 << 20))

    kernel = functools.partial(
        _mlp_kernel,
        n_layers=n_layers,
        has_shortcut=shortcut is not None,
        has_norm=norm is not None,
        eps=eps,
    )

    out = pl.pallas_call(
        kernel,
        out_shape=jax.ShapeDtypeStruct((Mp, out_dim), x.dtype),
        grid_spec=pltpu.PrefetchScalarGridSpec(
            num_scalar_prefetch=0,
            grid=(Mp // TM,),
            in_specs=in_specs,
            out_specs=out_spec,
        ),
        compiler_params=pltpu.CompilerParams(
            dimension_semantics=("parallel",),
            vmem_limit_bytes=vmem_limit,
        ),
    )(xf, *flat_params)

    return out[:M].reshape(orig_lead + (out_dim,))


# --------------------------------------------------------------------------------------
# Synthetic parameters matching the PyTorch module's shapes / special inits.
# Linear weights are pre-transposed to (in, out) and stored in bf16 (MXU operand dtype);
# biases / LN params stay f32.
# --------------------------------------------------------------------------------------
def init_params(key, in_dim, hidden_dim, out_dim, depth, *,
                post_norm=False, zero_init_output=False, add_shortcut=False):
    assert depth >= 2
    dims = [in_dim] + [hidden_dim] * (depth - 1) + [out_dim]
    keys = jax.random.split(key, 2 * depth)
    layers = []
    for i in range(depth):
        fan_in, fan_out = dims[i], dims[i + 1]
        w = jax.random.normal(keys[2 * i], (fan_in, fan_out), jnp.float32) / math.sqrt(fan_in)
        b = jax.random.normal(keys[2 * i + 1], (1, fan_out), jnp.float32) * 0.02
        if zero_init_output and i == depth - 1:
            w = jnp.zeros_like(w)
            b = jnp.zeros_like(b)
        layers.append((w.astype(jnp.bfloat16), b))

    shortcut = None
    if add_shortcut:
        wsc = jnp.eye(in_dim, out_dim, dtype=jnp.float32)          # nn.init.eye_
        bsc = jnp.zeros((1, out_dim), jnp.float32)                 # nn.init.zeros_
        shortcut = (wsc.astype(jnp.bfloat16), bsc)

    norm = None
    if post_norm:
        norm = (jnp.ones((1, out_dim), jnp.float32), jnp.zeros((1, out_dim), jnp.float32))

    return {"layers": layers, "shortcut": shortcut, "norm": norm}


# --------------------------------------------------------------------------------------
# Pure-JAX f32 reference mirroring the PyTorch module (exact erf GELU, biased LN variance).
# --------------------------------------------------------------------------------------
def reference(x, params, *, eps: float = 1e-5):
    layers = params["layers"]
    n = len(layers)
    x0 = x.astype(jnp.float32)
    h = x0
    for i, (w, b) in enumerate(layers):
        h = h @ w.astype(jnp.float32) + b
        if i < n - 1:
            h = 0.5 * h * (1.0 + jax.lax.erf(h / math.sqrt(2.0)))   # PyTorch default gelu
    if params["shortcut"] is not None:
        wsc, bsc = params["shortcut"]
        h = h + x0 @ wsc.astype(jnp.float32) + bsc
    if params["norm"] is not None:
        g, be = params["norm"]
        mu = jnp.mean(h, axis=-1, keepdims=True)
        var = jnp.mean((h - mu) ** 2, axis=-1, keepdims=True)
        h = (h - mu) / jnp.sqrt(var + eps) * g + be
    return h


if __name__ == "__main__":
    B, N, in_dim, hidden_dim, out_dim, depth = 2, 8, 32, 64, 32, 3

    key = jax.random.PRNGKey(0)
    kx, kp = jax.random.split(key)
    x = jax.random.normal(kx, (B, N, in_dim), jnp.float32)
    params = init_params(kp, in_dim, hidden_dim, out_dim, depth,
                         post_norm=True, zero_init_output=False, add_shortcut=True)

    out = mlp_forward(x, params)
    out = jax.block_until_ready(out)

    ref = reference(x, params)
    assert out.shape == (B, N, out_dim)
    max_err = float(jnp.max(jnp.abs(out - ref)))
    # bf16 MXU operands (f32 accumulation) -> tolerance loosened vs pure-f32 math.
    assert jnp.allclose(out, ref, rtol=3e-2, atol=3e-2), max_err
    print("KERNEL_OK")
</pallas_src>

<mosaic_0001>
module attributes {stable_mosaic.version = 11 : i64} {
  func.func @_mlp_kernel(%arg0: i32, %arg1: memref<16x32xf32, #tpu.memory_space<vmem>>, %arg2: memref<32x64xbf16, #tpu.memory_space<vmem>>, %arg3: memref<1x64xf32, #tpu.memory_space<vmem>>, %arg4: memref<64x64xbf16, #tpu.memory_space<vmem>>, %arg5: memref<1x64xf32, #tpu.memory_space<vmem>>, %arg6: memref<64x32xbf16, #tpu.memory_space<vmem>>, %arg7: memref<1x32xf32, #tpu.memory_space<vmem>>, %arg8: memref<32x32xbf16, #tpu.memory_space<vmem>>, %arg9: memref<1x32xf32, #tpu.memory_space<vmem>>, %arg10: memref<1x32xf32, #tpu.memory_space<vmem>>, %arg11: memref<1x32xf32, #tpu.memory_space<vmem>>, %arg12: memref<16x32xf32, #tpu.memory_space<vmem>>) attributes {dimension_semantics = [#tpu.dimension_semantics<parallel>], iteration_bounds = array<i64: 1>, scalar_prefetch = 0 : i64, scratch_operands = 0 : i64, tpu.core_type = #tpu.core_type<tc>, window_params = [{transform_indices = @transform_0, window_bounds = array<i64: 16, 32>}, {pipeline_mode = #tpu.pipeline_mode<synchronous>, transform_indices = @transform_1, window_bounds = array<i64: 32, 64>}, {pipeline_mode = #tpu.pipeline_mode<synchronous>, transform_indices = @transform_2, window_bounds = array<i64: 1, 64>}, {pipeline_mode = #tpu.pipeline_mode<synchronous>, transform_indices = @transform_3, window_bounds = array<i64: 64, 64>}, {pipeline_mode = #tpu.pipeline_mode<synchronous>, transform_indices = @transform_4, window_bounds = array<i64: 1, 64>}, {pipeline_mode = #tpu.pipeline_mode<synchronous>, transform_indices = @transform_5, window_bounds = array<i64: 64, 32>}, {pipeline_mode = #tpu.pipeline_mode<synchronous>, transform_indices = @transform_6, window_bounds = array<i64: 1, 32>}, {pipeline_mode = #tpu.pipeline_mode<synchronous>, transform_indices = @transform_7, window_bounds = array<i64: 32, 32>}, {pipeline_mode = #tpu.pipeline_mode<synchronous>, transform_indices = @transform_8, window_bounds = array<i64: 1, 32>}, {pipeline_mode = #tpu.pipeline_mode<synchronous>, transform_indices = @transform_9, window_bounds = array<i64: 1, 32>}, {pipeline_mode = #tpu.pipeline_mode<synchronous>, transform_indices = @transform_10, window_bounds = array<i64: 1, 32>}, {transform_indices = @transform_11, window_bounds = array<i64: 16, 32>}]} {
    %c0 = arith.constant 0 : index
    %c0_0 = arith.constant 0 : index
    %0 = vector.load %arg1[%c0, %c0_0] : memref<16x32xf32, #tpu.memory_space<vmem>>, vector<16x32xf32>
    %1 = arith.truncf %0 : vector<16x32xf32> to vector<16x32xbf16>
    %c0_1 = arith.constant 0 : index
    %c0_2 = arith.constant 0 : index
    %2 = vector.load %arg2[%c0_1, %c0_2] : memref<32x64xbf16, #tpu.memory_space<vmem>>, vector<32x64xbf16>
    %c0_3 = arith.constant 0 : index
    %c0_4 = arith.constant 0 : index
    %3 = vector.load %arg3[%c0_3, %c0_4] : memref<1x64xf32, #tpu.memory_space<vmem>>, vector<1x64xf32>
    %4 = vector.shape_cast %3 : vector<1x64xf32> to vector<64xf32>
    %cst = arith.constant dense<0.000000e+00> : vector<16x64xf32>
    %5 = tpu.matmul %1, %2, %cst {dimension_numbers = #tpu.dot_dimension_numbers<[1], [0], [0], [1], [0, 0, 1, 1], [], []>} : vector<16x32xbf16>, vector<32x64xbf16>, vector<16x64xf32> -> vector<16x64xf32>
    %6 = vector.shape_cast %4 : vector<64xf32> to vector<1x64xf32>
    %7 = vector.broadcast %6 : vector<1x64xf32> to vector<16x64xf32>
    %8 = arith.addf %5, %7 : vector<16x64xf32>
    %cst_5 = arith.constant 5.000000e-01 : f32
    %9 = vector.broadcast %cst_5 : f32 to vector<16x64xf32>
    %10 = arith.mulf %9, %8 : vector<16x64xf32>
    %cst_6 = arith.constant 0.707106769 : f32
    %11 = vector.broadcast %cst_6 : f32 to vector<16x64xf32>
    %12 = arith.mulf %8, %11 : vector<16x64xf32>
    %13 = math.absf %12 : vector<16x64xf32>
    %cst_7 = arith.constant 0.327591091 : f32
    %14 = vector.broadcast %cst_7 : f32 to vector<16x64xf32>
    %15 = arith.mulf %14, %13 : vector<16x64xf32>
    %cst_8 = arith.constant 1.000000e+00 : f32
    %16 = vector.broadcast %cst_8 : f32 to vector<16x64xf32>
    %17 = arith.addf %16, %15 : vector<16x64xf32>
    %cst_9 = arith.constant 1.000000e+00 : f32
    %18 = vector.broadcast %cst_9 : f32 to vector<16x64xf32>
    %19 = arith.divf %18, %17 : vector<16x64xf32>
    %cst_10 = arith.constant 1.06140542 : f32
    %20 = vector.broadcast %cst_10 : f32 to vector<16x64xf32>
    %21 = arith.mulf %20, %19 : vector<16x64xf32>
    %cst_11 = arith.constant -1.45315206 : f32
    %22 = vector.broadcast %cst_11 : f32 to vector<16x64xf32>
    %23 = arith.addf %21, %22 : vector<16x64xf32>
    %24 = arith.mulf %23, %19 : vector<16x64xf32>
    %cst_12 = arith.constant 1.42141378 : f32
    %25 = vector.broadcast %cst_12 : f32 to vector<16x64xf32>
    %26 = arith.addf %24, %25 : vector<16x64xf32>
    %27 = arith.mulf %26, %19 : vector<16x64xf32>
    %cst_13 = arith.constant -0.284496725 : f32
    %28 = vector.broadcast %cst_13 : f32 to vector<16x64xf32>
    %29 = arith.addf %27, %28 : vector<16x64xf32>
    %30 = arith.mulf %29, %19 : vector<16x64xf32>
    %cst_14 = arith.constant 0.254829586 : f32
    %31 = vector.broadcast %cst_14 : f32 to vector<16x64xf32>
    %32 = arith.addf %30, %31 : vector<16x64xf32>
    %33 = arith.mulf %32, %19 : vector<16x64xf32>
    %cst_15 = arith.constant 0.000000e+00 : f32
    %34 = vector.broadcast %cst_15 : f32 to vector<16x64xf32>
    %35 = arith.subf %34, %13 : vector<16x64xf32>
    %36 = arith.mulf %35, %13 : vector<16x64xf32>
    %37 = math.exp %36 : vector<16x64xf32>
    %38 = arith.mulf %33, %37 : vector<16x64xf32>
    %cst_16 = arith.constant 1.000000e+00 : f32
    %39 = vector.broadcast %cst_16 : f32 to vector<16x64xf32>
    %40 = arith.subf %39, %38 : vector<16x64xf32>
    %cst_17 = arith.constant 0.000000e+00 : f32
    %41 = vector.broadcast %cst_17 : f32 to vector<16x64xf32>
    %42 = arith.cmpf olt, %12, %41 : vector<16x64xf32>
    %cst_18 = arith.constant 0.000000e+00 : f32
    %43 = vector.broadcast %cst_18 : f32 to vector<16x64xf32>
    %44 = arith.subf %43, %40 : vector<16x64xf32>
    %45 = arith.select %42, %44, %40 : vector<16x64xi1>, vector<16x64xf32>
    %cst_19 = arith.constant 1.000000e+00 : f32
    %46 = vector.broadcast %cst_19 : f32 to vector<16x64xf32>
    %47 = arith.addf %46, %45 : vector<16x64xf32>
    %48 = arith.mulf %10, %47 : vector<16x64xf32>
    %c0_20 = arith.constant 0 : index
    %c0_21 = arith.constant 0 : index
    %49 = vector.load %arg4[%c0_20, %c0_21] : memref<64x64xbf16, #tpu.memory_space<vmem>>, vector<64x64xbf16>
    %c0_22 = arith.constant 0 : index
    %c0_23 = arith.constant 0 : index
    %50 = vector.load %arg5[%c0_22, %c0_23] : memref<1x64xf32, #tpu.memory_space<vmem>>, vector<1x64xf32>
    %51 = vector.shape_cast %50 : vector<1x64xf32> to vector<64xf32>
    %52 = arith.truncf %48 : vector<16x64xf32> to vector<16x64xbf16>
    %cst_24 = arith.constant dense<0.000000e+00> : vector<16x64xf32>
    %53 = tpu.matmul %52, %49, %cst_24 {dimension_numbers = #tpu.dot_dimension_numbers<[1], [0], [0], [1], [0, 0, 1, 1], [], []>} : vector<16x64xbf16>, vector<64x64xbf16>, vector<16x64xf32> -> vector<16x64xf32>
    %54 = vector.shape_cast %51 : vector<64xf32> to vector<1x64xf32>
    %55 = vector.broadcast %54 : vector<1x64xf32> to vector<16x64xf32>
    %56 = arith.addf %53, %55 : vector<16x64xf32>
    %cst_25 = arith.constant 5.000000e-01 : f32
    %57 = vector.broadcast %cst_25 : f32 to vector<16x64xf32>
    %58 = arith.mulf %57, %56 : vector<16x64xf32>
    %cst_26 = arith.constant 0.707106769 : f32
    %59 = vector.broadcast %cst_26 : f32 to vector<16x64xf32>
    %60 = arith.mulf %56, %59 : vector<16x64xf32>
    %61 = math.absf %60 : vector<16x64xf32>
    %cst_27 = arith.constant 0.327591091 : f32
    %62 = vector.broadcast %cst_27 : f32 to vector<16x64xf32>
    %63 = arith.mulf %62, %61 : vector<16x64xf32>
    %cst_28 = arith.constant 1.000000e+00 : f32
    %64 = vector.broadcast %cst_28 : f32 to vector<16x64xf32>
    %65 = arith.addf %64, %63 : vector<16x64xf32>
    %cst_29 = arith.constant 1.000000e+00 : f32
    %66 = vector.broadcast %cst_29 : f32 to vector<16x64xf32>
    %67 = arith.divf %66, %65 : vector<16x64xf32>
    %cst_30 = arith.constant 1.06140542 : f32
    %68 = vector.broadcast %cst_30 : f32 to vector<16x64xf32>
    %69 = arith.mulf %68, %67 : vector<16x64xf32>
    %cst_31 = arith.constant -1.45315206 : f32
    %70 = vector.broadcast %cst_31 : f32 to vector<16x64xf32>
    %71 = arith.addf %69, %70 : vector<16x64xf32>
    %72 = arith.mulf %71, %67 : vector<16x64xf32>
    %cst_32 = arith.constant 1.42141378 : f32
    %73 = vector.broadcast %cst_32 : f32 to vector<16x64xf32>
    %74 = arith.addf %72, %73 : vector<16x64xf32>
    %75 = arith.mulf %74, %67 : vector<16x64xf32>
    %cst_33 = arith.constant -0.284496725 : f32
    %76 = vector.broadcast %cst_33 : f32 to vector<16x64xf32>
    %77 = arith.addf %75, %76 : vector<16x64xf32>
    %78 = arith.mulf %77, %67 : vector<16x64xf32>
    %cst_34 = arith.constant 0.254829586 : f32
    %79 = vector.broadcast %cst_34 : f32 to vector<16x64xf32>
    %80 = arith.addf %78, %79 : vector<16x64xf32>
    %81 = arith.mulf %80, %67 : vector<16x64xf32>
    %cst_35 = arith.constant 0.000000e+00 : f32
    %82 = vector.broadcast %cst_35 : f32 to vector<16x64xf32>
    %83 = arith.subf %82, %61 : vector<16x64xf32>
    %84 = arith.mulf %83, %61 : vector<16x64xf32>
    %85 = math.exp %84 : vector<16x64xf32>
    %86 = arith.mulf %81, %85 : vector<16x64xf32>
    %cst_36 = arith.constant 1.000000e+00 : f32
    %87 = vector.broadcast %cst_36 : f32 to vector<16x64xf32>
    %88 = arith.subf %87, %86 : vector<16x64xf32>
    %cst_37 = arith.constant 0.000000e+00 : f32
    %89 = vector.broadcast %cst_37 : f32 to vector<16x64xf32>
    %90 = arith.cmpf olt, %60, %89 : vector<16x64xf32>
    %cst_38 = arith.constant 0.000000e+00 : f32
    %91 = vector.broadcast %cst_38 : f32 to vector<16x64xf32>
    %92 = arith.subf %91, %88 : vector<16x64xf32>
    %93 = arith.select %90, %92, %88 : vector<16x64xi1>, vector<16x64xf32>
    %cst_39 = arith.constant 1.000000e+00 : f32
    %94 = vector.broadcast %cst_39 : f32 to vector<16x64xf32>
    %95 = arith.addf %94, %93 : vector<16x64xf32>
    %96 = arith.mulf %58, %95 : vector<16x64xf32>
    %c0_40 = arith.constant 0 : index
    %c0_41 = arith.constant 0 : index
    %97 = vector.load %arg6[%c0_40, %c0_41] : memref<64x32xbf16, #tpu.memory_space<vmem>>, vector<64x32xbf16>
    %c0_42 = arith.constant 0 : index
    %c0_43 = arith.constant 0 : index
    %98 = vector.load %arg7[%c0_42, %c0_43] : memref<1x32xf32, #tpu.memory_space<vmem>>, vector<1x32xf32>
    %99 = vector.shape_cast %98 : vector<1x32xf32> to vector<32xf32>
    %100 = arith.truncf %96 : vector<16x64xf32> to vector<16x64xbf16>
    %cst_44 = arith.constant dense<0.000000e+00> : vector<16x32xf32>
    %101 = tpu.matmul %100, %97, %cst_44 {dimension_numbers = #tpu.dot_dimension_numbers<[1], [0], [0], [1], [0, 0, 1, 1], [], []>} : vector<16x64xbf16>, vector<64x32xbf16>, vector<16x32xf32> -> vector<16x32xf32>
    %102 = vector.shape_cast %99 : vector<32xf32> to vector<1x32xf32>
    %103 = vector.broadcast %102 : vector<1x32xf32> to vector<16x32xf32>
    %104 = arith.addf %101, %103 : vector<16x32xf32>
    %c0_45 = arith.constant 0 : index
    %c0_46 = arith.constant 0 : index
    %105 = vector.load %arg8[%c0_45, %c0_46] : memref<32x32xbf16, #tpu.memory_space<vmem>>, vector<32x32xbf16>
    %c0_47 = arith.constant 0 : index
    %c0_48 = arith.constant 0 : index
    %106 = vector.load %arg9[%c0_47, %c0_48] : memref<1x32xf32, #tpu.memory_space<vmem>>, vector<1x32xf32>
    %107 = vector.shape_cast %106 : vector<1x32xf32> to vector<32xf32>
    %cst_49 = arith.constant dense<0.000000e+00> : vector<16x32xf32>
    %108 = tpu.matmul %1, %105, %cst_49 {dimension_numbers = #tpu.dot_dimension_numbers<[1], [0], [0], [1], [0, 0, 1, 1], [], []>} : vector<16x32xbf16>, vector<32x32xbf16>, vector<16x32xf32> -> vector<16x32xf32>
    %109 = arith.addf %104, %108 : vector<16x32xf32>
    %110 = vector.shape_cast %107 : vector<32xf32> to vector<1x32xf32>
    %111 = vector.broadcast %110 : vector<1x32xf32> to vector<16x32xf32>
    %112 = arith.addf %109, %111 : vector<16x32xf32>
    %c0_50 = arith.constant 0 : index
    %c0_51 = arith.constant 0 : index
    %113 = vector.load %arg10[%c0_50, %c0_51] : memref<1x32xf32, #tpu.memory_space<vmem>>, vector<1x32xf32>
    %114 = vector.shape_cast %113 : vector<1x32xf32> to vector<32xf32>
    %c0_52 = arith.constant 0 : index
    %c0_53 = arith.constant 0 : index
    %115 = vector.load %arg11[%c0_52, %c0_53] : memref<1x32xf32, #tpu.memory_space<vmem>>, vector<1x32xf32>
    %116 = vector.shape_cast %115 : vector<1x32xf32> to vector<32xf32>
    %cst_54 = arith.constant dense<0.000000e+00> : vector<16xf32>
    %117 = vector.multi_reduction <add>, %112, %cst_54 [1] : vector<16x32xf32> to vector<16xf32>
    %118 = vector.shape_cast %117 : vector<16xf32> to vector<16x1xf32>
    %cst_55 = arith.constant 3.200000e+01 : f32
    %119 = vector.broadcast %cst_55 : f32 to vector<16x1xf32>
    %120 = arith.divf %118, %119 : vector<16x1xf32>
    %121 = vector.broadcast %120 : vector<16x1xf32> to vector<16x32xf32>
    %122 = arith.subf %112, %121 : vector<16x32xf32>
    %123 = vector.broadcast %120 : vector<16x1xf32> to vector<16x32xf32>
    %124 = arith.subf %112, %123 : vector<16x32xf32>
    %125 = arith.mulf %122, %124 : vector<16x32xf32>
    %cst_56 = arith.constant dense<0.000000e+00> : vector<16xf32>
    %126 = vector.multi_reduction <add>, %125, %cst_56 [1] : vector<16x32xf32> to vector<16xf32>
    %127 = vector.shape_cast %126 : vector<16xf32> to vector<16x1xf32>
    %cst_57 = arith.constant 3.200000e+01 : f32
    %128 = vector.broadcast %cst_57 : f32 to vector<16x1xf32>
    %129 = arith.divf %127, %128 : vector<16x1xf32>
    %130 = vector.broadcast %120 : vector<16x1xf32> to vector<16x32xf32>
    %131 = arith.subf %112, %130 : vector<16x32xf32>
    %cst_58 = arith.constant 9.99999974E-6 : f32
    %132 = vector.broadcast %cst_58 : f32 to vector<16x1xf32>
    %133 = arith.addf %129, %132 : vector<16x1xf32>
    %134 = math.rsqrt %133 : vector<16x1xf32>
    %135 = vector.broadcast %134 : vector<16x1xf32> to vector<16x32xf32>
    %136 = arith.mulf %131, %135 : vector<16x32xf32>
    %137 = vector.shape_cast %114 : vector<32xf32> to vector<1x32xf32>
    %138 = vector.broadcast %137 : vector<1x32xf32> to vector<16x32xf32>
    %139 = arith.mulf %136, %138 : vector<16x32xf32>
    %140 = vector.shape_cast %116 : vector<32xf32> to vector<1x32xf32>
    %141 = vector.broadcast %140 : vector<1x32xf32> to vector<16x32xf32>
    %142 = arith.addf %139, %141 : vector<16x32xf32>
    %c0_59 = arith.constant 0 : index
    %c0_60 = arith.constant 0 : index
    %143 = vector.load %arg12[%c0_59, %c0_60] : memref<16x32xf32, #tpu.memory_space<vmem>>, vector<16x32xf32>
    tpu.vector_store %arg12[%c0_59, %c0_60], %142 {strides = array<i32>} : memref<16x32xf32, #tpu.memory_space<vmem>>, vector<16x32xf32>,
    return
  }
  func.func @transform_0(%arg0: i32) -> (i32, i32) {
    %c0_i32 = arith.constant 0 : i32
    %c0_i32_0 = arith.constant 0 : i32
    return %arg0, %c0_i32 : i32, i32
  }
  func.func @transform_1(%arg0: i32) -> (i32, i32) {
    %c0_i32 = arith.constant 0 : i32
    %c0_i32_0 = arith.constant 0 : i32
    %c0_i32_1 = arith.constant 0 : i32
    return %c0_i32, %c0_i32_0 : i32, i32
  }
  func.func @transform_2(%arg0: i32) -> (i32, i32) {
    %c0_i32 = arith.constant 0 : i32
    %c0_i32_0 = arith.constant 0 : i32
    %c0_i32_1 = arith.constant 0 : i32
    return %c0_i32, %c0_i32_0 : i32, i32
  }
  func.func @transform_3(%arg0: i32) -> (i32, i32) {
    %c0_i32 = arith.constant 0 : i32
    %c0_i32_0 = arith.constant 0 : i32
    %c0_i32_1 = arith.constant 0 : i32
    return %c0_i32, %c0_i32_0 : i32, i32
  }
  func.func @transform_4(%arg0: i32) -> (i32, i32) {
    %c0_i32 = arith.constant 0 : i32
    %c0_i32_0 = arith.constant 0 : i32
    %c0_i32_1 = arith.constant 0 : i32
    return %c0_i32, %c0_i32_0 : i32, i32
  }
  func.func @transform_5(%arg0: i32) -> (i32, i32) {
    %c0_i32 = arith.constant 0 : i32
    %c0_i32_0 = arith.constant 0 : i32
    %c0_i32_1 = arith.constant 0 : i32
    return %c0_i32, %c0_i32_0 : i32, i32
  }
  func.func @transform_6(%arg0: i32) -> (i32, i32) {
    %c0_i32 = arith.constant 0 : i32
    %c0_i32_0 = arith.constant 0 : i32
    %c0_i32_1 = arith.constant 0 : i32
    return %c0_i32, %c0_i32_0 : i32, i32
  }
  func.func @transform_7(%arg0: i32) -> (i32, i32) {
    %c0_i32 = arith.constant 0 : i32
    %c0_i32_0 = arith.constant 0 : i32
    %c0_i32_1 = arith.constant 0 : i32
    return %c0_i32, %c0_i32_0 : i32, i32
  }
  func.func @transform_8(%arg0: i32) -> (i32, i32) {
    %c0_i32 = arith.constant 0 : i32
    %c0_i32_0 = arith.constant 0 : i32
    %c0_i32_1 = arith.constant 0 : i32
    return %c0_i32, %c0_i32_0 : i32, i32
  }
  func.func @transform_9(%arg0: i32) -> (i32, i32) {
    %c0_i32 = arith.constant 0 : i32
    %c0_i32_0 = arith.constant 0 : i32
    %c0_i32_1 = arith.constant 0 : i32
    return %c0_i32, %c0_i32_0 : i32, i32
  }
  func.func @transform_10(%arg0: i32) -> (i32, i32) {
    %c0_i32 = arith.constant 0 : i32
    %c0_i32_0 = arith.constant 0 : i32
    %c0_i32_1 = arith.constant 0 : i32
    return %c0_i32, %c0_i32_0 : i32, i32
  }
  func.func @transform_11(%arg0: i32) -> (i32, i32) {
    %c0_i32 = arith.constant 0 : i32
    %c0_i32_0 = arith.constant 0 : i32
    return %arg0, %c0_i32 : i32, i32
  }
}

</mosaic_0001>

<bundles_post_ra>
// kernel: tpu_custom_call.1
= control target key start
LH: loop header
LB: loop body
LE: loop exit
PB: predicated region body
PF: predicated region fallthrough
CT: control target
= control target key end

     0   :  { %16 = vsyncpa [#allocation3], 0  ;;  %s927_s0 = inlined_call_operand.vmem [shape: f32[16,32], index: 0, kind: input, shape index: {}]   ;;  %s928_s1 = inlined_call_operand.hbm [shape: bf16[32,64], index: 1, kind: input, shape index: {}]   ;;  %s929_s2 = inlined_call_operand.vmem [shape: f32[1,64], index: 2, kind: input, shape index: {}]   ;;  %s930_s3 = inlined_call_operand.vmem [shape: bf16[64,64], index: 3, kind: input, shape index: {}]   ;;  %s931_s4 = inlined_call_operand.vmem [shape: f32[1,64], index: 4, kind: input, shape index: {}]   ;;  %s932_s5 = inlined_call_operand.vmem [shape: bf16[64,32], index: 5, kind: input, shape index: {}]   ;;  %s933_s6 = inlined_call_operand.vmem [shape: f32[1,32], index: 6, kind: input, shape index: {}]   ;;  %s934_s7 = inlined_call_operand.hbm [shape: bf16[32,32], index: 7, kind: input, shape index: {}]   ;;  %s935_s8 = inlined_call_operand.vmem [shape: f32[1,32], index: 8, kind: input, shape index: {}]   ;;  %s936_s9 = inlined_call_operand.vmem [shape: f32[1,32], index: 9, kind: input, shape index: {}]   ;;  %s937_s10 = inlined_call_operand.vmem [shape: f32[1,32], index: 10, kind: input, shape index: {}]   ;;  %s938_s11 = inlined_call_operand.hbm [shape: f32[16,32], index: 11, kind: output, shape index: {}]  }
   0x1   :  { %17 = vsyncpa [#allocation6], 0 }
   0x2   :  { %18 = vsyncpa [#allocation4], 0  ;;  %s740_s17 = smov [#allocation2]   ;;  %s668_s21 = scalar_lea.hbm %s928_s1, 256 }
   0x3   :  { %s26_s18 = sshll.u32 %s740_s17, 4  ;;  %p669_p0 = scmp.ne.s32.totalorder %s928_s1, %s668_s21  ;;  %s27_s18 = int_to_ptr.vmem [resolvable:$true] %s26_s18 }
   0x4   :  { %p672_p1 = scmp.lt.u32.totalorder %s668_s21, %s928_s1 }
   0x6   :  { %p674_p2 = pnand %p672_p1, %p669_p0 }
   0x8   :  { %677 = shalt.err (!%p674_p2)
}
   0x9   :  { %s678_s26 = scalar_lea.vmem %s27_s18, 256  ;;  %p683_p4 = scmp.lt.s32.totalorder %s27_s18, %s27_s18 }
   0xa   :  { %p679_p3 = scmp.ne.s32.totalorder %s27_s18, %s678_s26  ;;  %p684_p5 = scmp.lt.s32.totalorder %s678_s26, %s678_s26 }
   0xc   :  { %p685_p6 = por %p684_p5, %p683_p4 }
   0xe   :  { %p686_p7 = pnand %p685_p6, %p679_p3 }
  0x10   :  { %689 = shalt.err (!%p686_p7)
}
  0x11   :  { %s741_s27 = smov 64   ;;  %s742_s28 = smov 4  }
  0x12   :  { %32 = dma.hbm_to_vmem [thread:$0]  %s928_s1, 256, %s27_s18, [#allocation3], %s741_s27, %s741_s27, %s742_s28  }
  0x13   :  { %s743_s12 = smov [#allocation5]   ;;  %s690_s16 = scalar_lea.hbm %s934_s7, 256 }
  0x14   :  { %s48_s13 = sshll.u32 %s743_s12, 4  ;;  %p691_p8 = scmp.ne.s32.totalorder %s934_s7, %s690_s16  ;;  %s49_s13 = int_to_ptr.vmem [resolvable:$true] %s48_s13 }
  0x15   :  { %p694_p9 = scmp.lt.u32.totalorder %s690_s16, %s934_s7 }
  0x17   :  { %p696_p10 = pnand %p694_p9, %p691_p8 }
  0x19   :  { %699 = shalt.err (!%p696_p10)
}
  0x1a   :  { %s700_s22 = scalar_lea.vmem %s49_s13, 256  ;;  %p705_p12 = scmp.lt.s32.totalorder %s49_s13, %s49_s13 }
  0x1b   :  { %p701_p11 = scmp.ne.s32.totalorder %s49_s13, %s700_s22  ;;  %p706_p13 = scmp.lt.s32.totalorder %s700_s22, %s700_s22 }
  0x1d   :  { %p707_p0 = por %p706_p13, %p705_p12 }
  0x1f   :  { %p708_p1 = pnand %p707_p0, %p701_p11 }
  0x21   :  { %711 = shalt.err (!%p708_p1)
}
  0x22   :  { %54 = dma.hbm_to_vmem [thread:$0]  %s934_s7, 256, %s49_s13, [#allocation6], %s741_s27, %s741_s27, %s742_s28  }
  0x23   :  { %734 = dma.done.wait [#allocation3], 256  }
  0x24   :  { %735 = vsyncadd [#allocation3], 4294967040 }
  0x25   :  { %736 = dma.done.wait [#allocation6], 256  }
  0x26   :  { %737 = vsyncadd [#allocation6], 4294967040  ;;  %v744_v0 = vmov 0.0   ;;  %vm745_vm0 = vmmov 0   ;;  %v636_v1 = vld [vmem:[#allocation2] sm:$0xff]   ;;  %v637_v2 = vld [vmem:[#allocation2 + $0x8] sm:$0xff]  }
  0x27   :  { %587 = vmatprep.subr.bf16.mxu0 %v744_v0  ;;  %591 = vmatprep.mubr.msk.bf16.mxu0 %vm745_vm0, %v744_v0  ;;  %v68_v3 = vld [vmem:[%s927_s0] sm:$0xff]  ;;  %v69_v4 = vld [vmem:[%s927_s0 + $0x8] sm:$0xff]  ;;  %vm94_vm1 = vcmask 261120   ;;  %v640_v8 = vld [vmem:[%s930_s3 + $0x10] sm:$0xff]   ;;  %vm233_vm4 = vcmask 523264   ;;  %s746_s26 = smov [#allocation7]  }
  0x28   :  { %595 = vmatprep.subr.bf16.mxu1 %v744_v0  ;;  %603 = vmatprep.mubr.msk.bf16.mxu1 %vm745_vm0, %v744_v0  ;;  %v846_v5 = vpack.c.bf16 %v69_v4, %v68_v3  ;;  %v638_v6 = vld [vmem:[%s930_s3] sm:$0xff]   ;;  %v639_v7 = vld [vmem:[%s930_s3 + $0x8] sm:$0xff]   ;;  %v641_v9 = vld [vmem:[%s930_s3 + $0x18] sm:$0xff]   ;;  %s536_s27 = sshll.u32 %s746_s26, 4  ;;  %s537_s27 = int_to_ptr.vmem [resolvable:$true] %s536_s27 }
  0x29   :  { %588 = vmatpush3.bf16.msra.mxu0 %v636_v1  ;;  %596 = vmatpush3.bf16.msra.mxu1 %v638_v6  ;;  %v549_v10 = vld [vmem:[%s929_s2] ss:$0 sm:$0xff]  ;;  %s712_s0 = scalar_lea.vmem %s537_s27, 256  ;;  %p717_p3 = scmp.lt.s32.totalorder %s537_s27, %s537_s27 }
  0x2a   :  { %589 = vmatprep.subr.bf16.mxu0 %v744_v0  ;;  %597 = vmatprep.subr.bf16.mxu1 %v744_v0  ;;  %v642_v6 = vld [vmem:[%s932_s5] sm:$0xff]   ;;  %p713_p2 = scmp.ne.s32.totalorder %s537_s27, %s712_s0  ;;  %p718_p4 = scmp.lt.s32.totalorder %s712_s0, %s712_s0 }
  0x2c   :  { %p719_p5 = por %p718_p4, %p717_p3 }
  0x2d   :  { %590 = vmatpush3.bf16.msra.mxu0 %v637_v2  ;;  %598 = vmatpush3.bf16.msra.mxu1 %v639_v7  ;;  %v643_v7 = vld [vmem:[%s932_s5 + $0x8] sm:$0xff]  }
  0x2e   :  { %607 = vmatprep.subr.bf16.mxu0 %v744_v0  ;;  %599 = vmatprep.subr.bf16.mxu1 %v744_v0  ;;  %p720_p6 = pnand %p719_p5, %p713_p2 }
  0x30   :  { %592 = vmatmul.mubr.msk.bf16.vlgmr.msra.gmra.mrb[0].mxu0 %vm94_vm1, %v846_v5 }
  0x31   :  { %615 = vmatprep.mubr.msk.bf16.mxu0 %vm745_vm0, %v744_v0  ;;  %600 = vmatpush3.bf16.msra.mxu1 %v640_v8  ;;  %v644_v8 = vld [vmem:[#allocation5] sm:$0xff]  }
  0x32   :  { %601 = vmatprep.subr.bf16.mxu1 %v744_v0  ;;  %608 = vmatpush3.bf16.msra.mxu0 %v642_v6 }
  0x33   :  { %609 = vmatprep.subr.bf16.mxu0 %v744_v0 }
  0x35   :  { %602 = vmatpush3.bf16.msra.mxu1 %v641_v9  ;;  %v645_v9 = vld [vmem:[%s932_s5 + $0x10] sm:$0xff]  }
  0x36   :  { %619 = vmatprep.subr.bf16.mxu1 %v744_v0  ;;  %610 = vmatpush3.bf16.msra.mxu0 %v643_v7 }
  0x37   :  { %611 = vmatprep.subr.bf16.mxu0 %v744_v0 }
  0x3a   :  { %612 = vmatpush3.bf16.msra.mxu0 %v645_v9 }
  0x3b   :  { %613 = vmatprep.subr.bf16.mxu0 %v744_v0 }
 0x103   :  { %v132_v11 = vpop.f32.mrb[0].mxu0 }
 0x104   :  { %v133_v12 = vadd.f32 %v549_v10, %v132_v11  ;;  %v593_v13 = vpop.f32.mrb[1].mxu0  ;;  %v647_v11 = vld [vmem:[%s932_s5 + $0x18] sm:$0xff]  }
 0x105   :  { %v135_v14 = vpop.f32.mrb[2].mxu0  ;;  %614 = vmatpush3.bf16.msra.mxu0 %v647_v11 }
 0x106   :  { %v141_v15 = vmul.f32 0.70710677, %v133_v12  ;;  %v136_v16 = vadd.f32 %v549_v10, %v135_v14  ;;  %v594_v17 = vpop.f32.mrb[3].mxu0  ;;  %v139_v62 = vmul.f32 0.5, %v133_v12  ;;  %v646_v10 = vld [vmem:[#allocation5 + $0x8] sm:$0xff]  }
 0x107   :  { %v553_v12 = vld [vmem:[%s931_s4] ss:$0 sm:$0xff] }
 0x108   :  { %v143_v18 = vand.u32 2147483647, %v141_v15  ;;  %v142_v19 = vmul.f32 0.70710677, %v136_v16  ;;  %vm183_vm2 = vcmp.lt.f32.partialorder %v141_v15, 0.0  ;;  %v140_v63 = vmul.f32 0.5, %v136_v16 }
 0x10a   :  { %v145_v20 = vmul.f32 0.3275911, %v143_v18  ;;  %v144_v21 = vand.u32 2147483647, %v142_v19  ;;  %v171_v25 = vsub.f32 0.0, %v143_v18  ;;  %vm184_vm3 = vcmp.lt.f32.partialorder %v142_v19, 0.0 }
 0x10c   :  { %v147_v22 = vadd.f32 1.0, %v145_v20  ;;  %v146_v23 = vmul.f32 0.3275911, %v144_v21  ;;  %v172_v26 = vsub.f32 0.0, %v144_v21  ;;  %v173_v28 = vmul.f32 %v171_v25, %v143_v18 }
 0x10e   :  { %648 = vrcp.f32 %v147_v22  ;;  %v148_v24 = vadd.f32 1.0, %v146_v23  ;;  %v174_v32 = vmul.f32 %v172_v26, %v144_v21  ;;  %v175_v33 = vmul.f32 1.442695, %v173_v28 }
 0x110   :  { %650 = vrcp.f32 %v148_v24  ;;  %v177_v38 = vmul.f32 1.442695, %v174_v32 }
 0x111   :  { %652 = vpow2.f32 %v175_v33 }
 0x112   :  { %654 = vpow2.f32 %v177_v38 }
 0x118   :  { %v649_v27 = vpop.eup %648 }
 0x119   :  { %v153_v29 = vmul.f32 1.0614054, %v649_v27 }
 0x11a   :  { %v651_v30 = vpop.eup %650 }
 0x11b   :  { %v155_v31 = vadd.f32 -1.4531521, %v153_v29  ;;  %v154_v34 = vmul.f32 1.0614054, %v651_v30  ;;  %v653_v49 = vpop.eup %652 }
 0x11c   :  { %v655_v53 = vpop.eup %654 }
 0x11d   :  { %v157_v35 = vmul.f32 %v649_v27, %v155_v31  ;;  %v156_v36 = vadd.f32 -1.4531521, %v154_v34 }
 0x11f   :  { %v159_v37 = vadd.f32 1.4214138, %v157_v35  ;;  %v158_v39 = vmul.f32 %v651_v30, %v156_v36 }
 0x121   :  { %v161_v40 = vmul.f32 %v649_v27, %v159_v37  ;;  %v160_v41 = vadd.f32 1.4214138, %v158_v39 }
 0x123   :  { %v163_v42 = vadd.f32 -0.28449672, %v161_v40  ;;  %v162_v43 = vmul.f32 %v651_v30, %v160_v41 }
 0x125   :  { %v165_v44 = vmul.f32 %v649_v27, %v163_v42  ;;  %v164_v45 = vadd.f32 -0.28449672, %v162_v43 }
 0x127   :  { %v167_v46 = vadd.f32 0.2548296, %v165_v44  ;;  %v166_v47 = vmul.f32 %v651_v30, %v164_v45 }
 0x129   :  { %v169_v48 = vmul.f32 %v649_v27, %v167_v46  ;;  %v168_v50 = vadd.f32 0.2548296, %v166_v47 }
 0x12b   :  { %v179_v51 = vmul.f32 %v653_v49, %v169_v48  ;;  %v170_v52 = vmul.f32 %v651_v30, %v168_v50 }
 0x12d   :  { %v181_v54 = vsub.f32 1.0, %v179_v51  ;;  %v180_v55 = vmul.f32 %v655_v53, %v170_v52 }
 0x12f   :  { %v185_v56 = vsub.f32 0.0, %v181_v54  ;;  %v182_v57 = vsub.f32 1.0, %v180_v55 }
 0x131   :  { %v187_v58 = vsel %vm183_vm2, %v185_v56, %v181_v54  ;;  %v186_v59 = vsub.f32 0.0, %v182_v57 }
 0x132   :  { %v189_v60 = vadd.f32 1.0, %v187_v58 }
 0x133   :  { %v188_v61 = vsel %vm184_vm3, %v186_v59, %v182_v57 }
 0x134   :  { %v190_v1 = vadd.f32 1.0, %v188_v61  ;;  %v191_v2 = vmul.f32 %v189_v60, %v139_v62 }
 0x136   :  { %v192_v3 = vmul.f32 %v190_v1, %v140_v63 }
 0x138   :  { %v202_v4 = vpack.c.bf16 %v192_v3, %v191_v2 }
 0x13a   :  { %604 = vmatmul.mubr.msk.bf16.vlgmr.msra.gmra.mrb[0].mxu1 %vm233_vm4, %v202_v4 }
 0x13b   :  { %623 = vmatprep.mubr.msk.bf16.mxu1 %vm745_vm0, %v744_v0  ;;  %620 = vmatpush3.bf16.msra.mxu1 %v644_v8 }
 0x13c   :  { %621 = vmatprep.subr.bf16.mxu1 %v744_v0 }
 0x13f   :  { %622 = vmatpush3.bf16.msra.mxu1 %v646_v10  ;;  %v559_v10 = vld [vmem:[%s933_s6] ss:$0 sm:$0xff] }
 0x142   :  { %624 = vmatmul.mubr.msk.bf16.vlgmr.msra.gmra.mrb[4].mxu1 %vm94_vm1, %v846_v5 }
 0x20d   :  { %v271_v13 = vpop.f32.mrb[0].mxu1 }
 0x20e   :  { %v272_v14 = vadd.f32 %v553_v12, %v271_v13  ;;  %v605_v15 = vpop.f32.mrb[1].mxu1 }
 0x20f   :  { %v274_v16 = vpop.f32.mrb[2].mxu1 }
 0x210   :  { %v280_v17 = vmul.f32 0.70710677, %v272_v14  ;;  %v275_v0 = vadd.f32 %v553_v12, %v274_v16  ;;  %v606_v18 = vpop.f32.mrb[3].mxu1  ;;  %v278_v62 = vmul.f32 0.5, %v272_v14  ;;  %v568_v14 = vld [vmem:[%s935_s8] ss:$0 sm:$0xff] }
 0x212   :  { %v282_v19 = vand.u32 2147483647, %v280_v17  ;;  %v281_v20 = vmul.f32 0.70710677, %v275_v0  ;;  %vm322_vm5 = vcmp.lt.f32.partialorder %v280_v17, 0.0  ;;  %v279_v63 = vmul.f32 0.5, %v275_v0 }
 0x214   :  { %v284_v21 = vmul.f32 0.3275911, %v282_v19  ;;  %v283_v22 = vand.u32 2147483647, %v281_v20  ;;  %v310_v5 = vsub.f32 0.0, %v282_v19  ;;  %vm323_vm6 = vcmp.lt.f32.partialorder %v281_v20, 0.0 }
 0x215   :  { %v467_v6 = vpop.f32.mrb[4].mxu1 }
 0x216   :  { %v286_v23 = vadd.f32 1.0, %v284_v21  ;;  %v285_v24 = vmul.f32 0.3275911, %v283_v22  ;;  %v311_v26 = vsub.f32 0.0, %v283_v22  ;;  %v312_v28 = vmul.f32 %v310_v5, %v282_v19  ;;  %v625_v7 = vpop.f32.mrb[5].mxu1 }
 0x217   :  { %v470_v8 = vpop.f32.mrb[6].mxu1 }
 0x218   :  { %656 = vrcp.f32 %v286_v23  ;;  %v287_v25 = vadd.f32 1.0, %v285_v24  ;;  %v313_v32 = vmul.f32 %v311_v26, %v283_v22  ;;  %v314_v33 = vmul.f32 1.442695, %v312_v28  ;;  %v626_v9 = vpop.f32.mrb[7].mxu1 }
 0x21a   :  { %658 = vrcp.f32 %v287_v25  ;;  %v316_v38 = vmul.f32 1.442695, %v313_v32 }
 0x21b   :  { %660 = vpow2.f32 %v314_v33 }
 0x21c   :  { %662 = vpow2.f32 %v316_v38 }
 0x222   :  { %v657_v27 = vpop.eup %656 }
 0x223   :  { %v292_v29 = vmul.f32 1.0614054, %v657_v27 }
 0x224   :  { %v659_v30 = vpop.eup %658 }
 0x225   :  { %v294_v31 = vadd.f32 -1.4531521, %v292_v29  ;;  %v293_v34 = vmul.f32 1.0614054, %v659_v30  ;;  %v661_v49 = vpop.eup %660 }
 0x226   :  { %v663_v53 = vpop.eup %662 }
 0x227   :  { %v296_v35 = vmul.f32 %v657_v27, %v294_v31  ;;  %v295_v36 = vadd.f32 -1.4531521, %v293_v34 }
 0x229   :  { %v298_v37 = vadd.f32 1.4214138, %v296_v35  ;;  %v297_v39 = vmul.f32 %v659_v30, %v295_v36 }
 0x22b   :  { %v300_v40 = vmul.f32 %v657_v27, %v298_v37  ;;  %v299_v41 = vadd.f32 1.4214138, %v297_v39  ;;  %v569_v39 = vld [vmem:[%s936_s9] ss:$0 sm:$0xff] }
 0x22d   :  { %v302_v42 = vadd.f32 -0.28449672, %v300_v40  ;;  %v301_v43 = vmul.f32 %v659_v30, %v299_v41  ;;  %v570_v41 = vld [vmem:[%s937_s10] ss:$0 sm:$0xff] }
 0x22f   :  { %v304_v44 = vmul.f32 %v657_v27, %v302_v42  ;;  %v303_v45 = vadd.f32 -0.28449672, %v301_v43 }
 0x231   :  { %v306_v46 = vadd.f32 0.2548296, %v304_v44  ;;  %v305_v47 = vmul.f32 %v659_v30, %v303_v45 }
 0x233   :  { %v308_v48 = vmul.f32 %v657_v27, %v306_v46  ;;  %v307_v50 = vadd.f32 0.2548296, %v305_v47 }
 0x235   :  { %v318_v51 = vmul.f32 %v661_v49, %v308_v48  ;;  %v309_v52 = vmul.f32 %v659_v30, %v307_v50 }
 0x237   :  { %v320_v54 = vsub.f32 1.0, %v318_v51  ;;  %v319_v55 = vmul.f32 %v663_v53, %v309_v52 }
 0x239   :  { %v324_v56 = vsub.f32 0.0, %v320_v54  ;;  %v321_v57 = vsub.f32 1.0, %v319_v55 }
 0x23b   :  { %v326_v58 = vsel %vm322_vm5, %v324_v56, %v320_v54  ;;  %v325_v59 = vsub.f32 0.0, %v321_v57 }
 0x23c   :  { %v328_v60 = vadd.f32 1.0, %v326_v58 }
 0x23d   :  { %v327_v61 = vsel %vm323_vm6, %v325_v59, %v321_v57 }
 0x23e   :  { %v329_v1 = vadd.f32 1.0, %v327_v61  ;;  %v330_v2 = vmul.f32 %v328_v60, %v278_v62 }
 0x240   :  { %v331_v3 = vmul.f32 %v329_v1, %v279_v63 }
 0x242   :  { %v341_v4 = vpack.c.bf16 %v331_v3, %v330_v2 }
 0x244   :  { %616 = vmatmul.mubr.msk.bf16.vlgmr.msra.gmra.mrb[4].mxu0 %vm233_vm4, %v341_v4 }
 0x317   :  { %v409_v11 = vpop.f32.mrb[4].mxu0 }
 0x318   :  { %v410_v12 = vadd.f32 %v559_v10, %v409_v11  ;;  %v617_v13 = vpop.f32.mrb[5].mxu0 }
 0x319   :  { %v412_v15 = vpop.f32.mrb[6].mxu0 }
 0x31a   :  { %v474_v16 = vadd.f32 %v467_v6, %v410_v12  ;;  %v413_v17 = vadd.f32 %v559_v10, %v412_v15  ;;  %v618_v0 = vpop.f32.mrb[7].mxu0 }
 0x31c   :  { %v475_v18 = vadd.f32 %v470_v8, %v413_v17  ;;  %v482_v19 = vadd.f32 %v568_v14, %v474_v16 }
 0x31e   :  { %v486_v20 = vsel %vm94_vm1, %v482_v19, 0.0  ;;  %v483_v21 = vadd.f32 %v568_v14, %v475_v18 }
 0x31f   :  { %487 = vadd.xlane.f32.xlu0 %v486_v20 }
 0x320   :  { %v489_v22 = vsel %vm94_vm1, %v483_v21, 0.0 }
 0x323   :  { %490 = vadd.xlane.f32.xlu0 %v489_v22 }
 0x3ac   :  { %v488_v23 = vpop.xlane.xlu0 %487 }
 0x3ad   :  { %v493_v24 = vmul.f32 0.03125, %v488_v23 }
 0x3af   :  { %v495_v25 = vsub.f32 %v482_v19, %v493_v24 }
 0x3b0   :  { %v491_v5 = vpop.xlane.xlu0 %490 }
 0x3b1   :  { %v494_v26 = vmul.f32 0.03125, %v491_v5  ;;  %v497_v27 = vmul.f32 %v495_v25, %v495_v25 }
 0x3b3   :  { %v496_v28 = vsub.f32 %v483_v21, %v494_v26  ;;  %v499_v29 = vsel %vm94_vm1, %v497_v27, 0.0 }
 0x3b4   :  { %500 = vadd.xlane.f32.xlu1 %v499_v29 }
 0x3b5   :  { %v498_v30 = vmul.f32 %v496_v28, %v496_v28 }
 0x3b7   :  { %v502_v31 = vsel %vm94_vm1, %v498_v30, 0.0 }
 0x3b8   :  { %503 = vadd.xlane.f32.xlu1 %v502_v31 }
 0x441   :  { %v501_v32 = vpop.xlane.xlu1 %500 }
 0x442   :  { %v505_v33 = vmul.f32 0.03125, %v501_v32 }
 0x444   :  { %v507_v34 = vadd.f32 1e-05, %v505_v33 }
 0x445   :  { %v504_v35 = vpop.xlane.xlu1 %503 }
 0x446   :  { %664 = vrsqrt.f32 %v507_v34  ;;  %v506_v36 = vmul.f32 0.03125, %v504_v35 }
 0x448   :  { %v508_v37 = vadd.f32 1e-05, %v506_v36 }
 0x44a   :  { %666 = vrsqrt.f32 %v508_v37 }
 0x450   :  { %v665_v38 = vpop.eup %664 }
 0x451   :  { %v511_v40 = vmul.f32 %v665_v38, %v495_v25 }
 0x453   :  { %v519_v42 = vmul.f32 %v569_v39, %v511_v40 }
 0x454   :  { %v667_v43 = vpop.eup %666 }
 0x455   :  { %v512_v44 = vmul.f32 %v667_v43, %v496_v28  ;;  %v527_v45 = vadd.f32 %v570_v41, %v519_v42 }
 0x457   :  { %v520_v46 = vmul.f32 %v569_v39, %v512_v44  ;;  %529 = vst.msk [vmem:[#allocation7] sm:$0xff] %vm94_vm1, %v527_v45 }
 0x459   :  { %v528_v47 = vadd.f32 %v570_v41, %v520_v46 }
 0x45b   :  { %530 = vst.msk [vmem:[#allocation7 + $0x8] sm:$0xff] %vm94_vm1, %v528_v47 }
 0x45c   :  { %723 = shalt.err (!%p720_p6)
}
 0x45d   :  { %s724_s28 = scalar_lea.hbm %s938_s11, 256 }
 0x45e   :  { %p725_p7 = scmp.ne.s32.totalorder %s938_s11, %s724_s28  ;;  %p728_p8 = scmp.lt.u32.totalorder %s724_s28, %s938_s11 }
 0x460   :  { %p730_p9 = pnand %p728_p8, %p725_p7 }
 0x462   :  { %733 = shalt.err (!%p730_p9)
}
 0x463   :  { %s747_s14 = smov 128   ;;  %s748_s15 = smov 8  }
 0x464   :  { %542 = dma.vmem_to_hbm [thread:$0]  %s537_s27, 256, %s938_s11, [#allocation4], %s747_s14, %s747_s14, %s748_s15  }
 0x465   :  { %738 = dma.done.wait [#allocation4], 256  }
 0x466   :  { %739 = vsyncadd [#allocation4], 4294967040 }
 0x467   :  { %546 = vsyncpa [#allocation3], 1 }
 0x468   :  { %547 = vsyncpa [#allocation6], 1 }
 0x469   :  { %548 = vsyncpa [#allocation4], 1 }

</bundles_post_ra>
